<compile_context>
chip_gen: v7x
topology: tpu7x:2x2x1
jax: 0.10.0
libtpu: 0.0.40
codegen_flags: <defaults>
</compile_context>

<pallas_src>
import functools

import jax
import jax.numpy as jnp
from jax.experimental import pallas as pl
from jax.experimental.pallas import tpu as pltpu

HIDDEN = 768          # BERT hidden size (Linear(768, text_fc_out))
BN_EPS = 1e-5         # nn.BatchNorm1d default eps


def text_encoder_kernel(x_ref, gamma_ref, beta_ref, w_ref, b_ref, bits_ref,
                        o_ref, *, keep_threshold, inv_keep):
    # x_ref: (B, 768) f32 -- CLS rows (gathered by the input DMA).
    x = x_ref[...]

    # ---- BatchNorm1d (training mode: batch mean, biased variance) ----------
    # Recomputed per output-feature tile: it is tiny (B x 768) and keeping it
    # tile-local makes the "parallel" grid axis correct on multi-core chips.
    mean = jnp.mean(x, axis=0, keepdims=True)                 # (1, 768)
    xc = x - mean
    var = jnp.mean(xc * xc, axis=0, keepdims=True)            # (1, 768)
    y = xc * jax.lax.rsqrt(var + BN_EPS) * gamma_ref[...] + beta_ref[...]

    # ---- Linear tile:  y @ W^T[:, tile] + b[tile]  (w_ref is W^T tile) ------
    z = jnp.dot(y, w_ref[...], preferred_element_type=jnp.float32)
    z = z + b_ref[...]                                        # (B, tn)

    # ---- ReLU ---------------------------------------------------------------
    z = jnp.maximum(z, 0.0)

    # ---- Dropout (training mode, inverted scaling) --------------------------
    if keep_threshold is not None:
        keep = bits_ref[...] >= jnp.uint32(keep_threshold)    # P(keep) = 1 - p
        z = jnp.where(keep, z * jnp.float32(inv_keep), 0.0)

    o_ref[...] = z


def text_encoder_forward(last_hidden_state, params, dropout_key=None,
                         dropout_p=0.4):
    """Pallas implementation of TextEncoder.forward after the BERT backbone."""
    B, S, H = last_hidden_state.shape
    assert H == HIDDEN
    w_t = params["w_t"]                                       # (768, F)
    f_out = w_t.shape[1]

    # Free (contiguous) reshape: row b is [S*H]; its first 768 entries are the
    # CLS token, so the kernel's x DMA gathers exactly last_hidden_state[:,0,:].
    lhs2d = last_hidden_state.reshape(B, S * HIDDEN).astype(jnp.float32)

    # Output-feature tiling (W^T streamed & double-buffered by BlockSpec).
    tn = min(f_out, 512)
    grid = (pl.cdiv(f_out, tn),)

    if dropout_p > 0.0:
        if dropout_key is None:
            raise ValueError("dropout_key is required when dropout_p > 0")
        bits = jax.random.bits(dropout_key, (B, f_out), dtype=jnp.uint32)
        keep_threshold = min(int(round(dropout_p * 2.0**32)), 2**32 - 1)
        inv_keep = 1.0 / (1.0 - dropout_p)
    else:
        bits = jnp.zeros((B, f_out), jnp.uint32)
        keep_threshold = None
        inv_keep = 1.0

    kernel = functools.partial(text_encoder_kernel,
                               keep_threshold=keep_threshold,
                               inv_keep=inv_keep)

    # VMEM budget (double-buffered tiles + headroom); stays v7x-safe (64 MiB).
    tile_bytes = 4 * (B * HIDDEN          # x (resident)
                      + 2 * HIDDEN        # gamma, beta
                      + HIDDEN * tn       # W^T tile
                      + tn                # bias tile
                      + 2 * B * tn)       # dropout-bits tile + output tile
    vmem_limit = max(16 << 20, min(2 * tile_bytes + (8 << 20), 64 << 20))

    flops = 2 * B * HIDDEN * f_out
    bytes_accessed = 4 * (B * HIDDEN + 2 * HIDDEN + HIDDEN * f_out + f_out
                          + 2 * B * f_out)

    return pl.pallas_call(
        kernel,
        out_shape=jax.ShapeDtypeStruct((B, f_out), jnp.float32),
        grid_spec=pltpu.PrefetchScalarGridSpec(
            num_scalar_prefetch=0,
            grid=grid,
            in_specs=[
                pl.BlockSpec((B, HIDDEN), lambda j: (0, 0)),   # CLS rows (resident)
                pl.BlockSpec((1, HIDDEN), lambda j: (0, 0)),   # BN gamma
                pl.BlockSpec((1, HIDDEN), lambda j: (0, 0)),   # BN beta
                pl.BlockSpec((HIDDEN, tn), lambda j: (0, j)),  # W^T tile (pipelined)
                pl.BlockSpec((1, tn), lambda j: (0, j)),       # bias tile
                pl.BlockSpec((B, tn), lambda j: (0, j)),       # dropout bits tile
            ],
            out_specs=pl.BlockSpec((B, tn), lambda j: (0, j)),
        ),
        compiler_params=pltpu.CompilerParams(
            dimension_semantics=("parallel",),
            vmem_limit_bytes=int(vmem_limit)),
        cost_estimate=pl.CostEstimate(flops=flops, transcendentals=0,
                                      bytes_accessed=bytes_accessed),
    )(lhs2d, params["gamma"], params["beta"], w_t, params["b"], bits)


def ref_forward_no_dropout(last_hidden_state, params):
    """Pure-JAX reference (dropout disabled) for correctness checking."""
    cls = last_hidden_state[:, 0, :].astype(jnp.float32)
    mean = cls.mean(axis=0, keepdims=True)
    var = ((cls - mean) ** 2).mean(axis=0, keepdims=True)
    y = (cls - mean) / jnp.sqrt(var + BN_EPS) * params["gamma"] + params["beta"]
    z = y @ params["w_t"] + params["b"]
    return jnp.maximum(z, 0.0)


if __name__ == "__main__":
    B, S, F_OUT = 8, 8, 128          # small shapes; hidden is fixed at 768
    DROPOUT_P = 0.4

    key = jax.random.PRNGKey(0)
    k_lhs, k_w, k_b, k_drop = jax.random.split(key, 4)

    # Synthetic stand-in for bert(...).last_hidden_state (see TODO above).
    last_hidden_state = jax.random.normal(k_lhs, (B, S, HIDDEN), jnp.float32)

    # Deterministic parameter init (shapes from the module's __init__).
    w = jax.random.normal(k_w, (F_OUT, HIDDEN), jnp.float32) * 0.02   # Linear.weight
    params = {
        "w_t": w.T,                                                   # (768, F)
        "b": jax.random.normal(k_b, (1, F_OUT), jnp.float32) * 0.02,  # Linear.bias
        "gamma": jnp.ones((1, HIDDEN), jnp.float32),                  # BN.weight
        "beta": jnp.zeros((1, HIDDEN), jnp.float32),                  # BN.bias
    }

    # --- Correctness check with dropout disabled (deterministic path) -------
    out_nodrop = jax.block_until_ready(
        text_encoder_forward(last_hidden_state, params, dropout_p=0.0))
    ref = ref_forward_no_dropout(last_hidden_state, params)
    assert out_nodrop.shape == (B, F_OUT)
    assert jnp.allclose(out_nodrop, ref, rtol=1e-4, atol=1e-4), "mismatch vs ref"

    # --- Full forward (dropout_p = 0.4, training-mode semantics) ------------
    out = jax.block_until_ready(
        text_encoder_forward(last_hidden_state, params, dropout_key=k_drop,
                             dropout_p=DROPOUT_P))
    assert out.shape == (B, F_OUT)
    assert bool(jnp.all(jnp.isfinite(out)))
    # Every surviving element must equal the (no-dropout) value * 1/(1-p).
    scaled_ref = ref * (1.0 / (1.0 - DROPOUT_P))
    nz = out != 0
    ok = jnp.where(nz, jnp.abs(out - scaled_ref) <= 1e-3 * (1.0 + jnp.abs(scaled_ref)),
                   True)
    assert bool(jnp.all(ok)), "dropout-scaled values mismatch"

    print("KERNEL_OK")
</pallas_src>

<mosaic_0001>
module attributes {stable_mosaic.version = 11 : i64} {
  func.func @text_encoder_kernel(%arg0: i32, %arg1: memref<8x768xf32, #tpu.memory_space<vmem>>, %arg2: memref<1x768xf32, #tpu.memory_space<vmem>>, %arg3: memref<1x768xf32, #tpu.memory_space<vmem>>, %arg4: memref<768x128xf32, #tpu.memory_space<vmem>>, %arg5: memref<1x128xf32, #tpu.memory_space<vmem>>, %arg6: memref<8x128xi32, #tpu.memory_space<vmem>>, %arg7: memref<8x128xf32, #tpu.memory_space<vmem>>) attributes {dimension_semantics = [#tpu.dimension_semantics<parallel>], iteration_bounds = array<i64: 1>, scalar_prefetch = 0 : i64, scratch_operands = 0 : i64, tpu.core_type = #tpu.core_type<tc>, window_params = [{transform_indices = @transform_0, window_bounds = array<i64: 8, 768>}, {pipeline_mode = #tpu.pipeline_mode<synchronous>, transform_indices = @transform_1, window_bounds = array<i64: 1, 768>}, {pipeline_mode = #tpu.pipeline_mode<synchronous>, transform_indices = @transform_2, window_bounds = array<i64: 1, 768>}, {transform_indices = @transform_3, window_bounds = array<i64: 768, 128>}, {transform_indices = @transform_4, window_bounds = array<i64: 1, 128>}, {transform_indices = @transform_5, window_bounds = array<i64: 8, 128>}, {transform_indices = @transform_6, window_bounds = array<i64: 8, 128>}]} {
    %c0 = arith.constant 0 : index
    %c0_0 = arith.constant 0 : index
    %0 = vector.load %arg1[%c0, %c0_0] : memref<8x768xf32, #tpu.memory_space<vmem>>, vector<8x768xf32>
    %cst = arith.constant dense<0.000000e+00> : vector<768xf32>
    %1 = vector.multi_reduction <add>, %0, %cst [0] : vector<8x768xf32> to vector<768xf32>
    %2 = vector.shape_cast %1 : vector<768xf32> to vector<1x768xf32>
    %cst_1 = arith.constant 8.000000e+00 : f32
    %3 = vector.broadcast %cst_1 : f32 to vector<1x768xf32>
    %4 = arith.divf %2, %3 : vector<1x768xf32>
    %5 = vector.broadcast %4 : vector<1x768xf32> to vector<8x768xf32>
    %6 = arith.subf %0, %5 : vector<8x768xf32>
    %7 = arith.mulf %6, %6 : vector<8x768xf32>
    %cst_2 = arith.constant dense<0.000000e+00> : vector<768xf32>
    %8 = vector.multi_reduction <add>, %7, %cst_2 [0] : vector<8x768xf32> to vector<768xf32>
    %9 = vector.shape_cast %8 : vector<768xf32> to vector<1x768xf32>
    %cst_3 = arith.constant 8.000000e+00 : f32
    %10 = vector.broadcast %cst_3 : f32 to vector<1x768xf32>
    %11 = arith.divf %9, %10 : vector<1x768xf32>
    %cst_4 = arith.constant 9.99999974E-6 : f32
    %12 = vector.broadcast %cst_4 : f32 to vector<1x768xf32>
    %13 = arith.addf %11, %12 : vector<1x768xf32>
    %14 = math.rsqrt %13 : vector<1x768xf32>
    %15 = vector.broadcast %14 : vector<1x768xf32> to vector<8x768xf32>
    %16 = arith.mulf %6, %15 : vector<8x768xf32>
    %c0_5 = arith.constant 0 : index
    %c0_6 = arith.constant 0 : index
    %17 = vector.load %arg2[%c0_5, %c0_6] : memref<1x768xf32, #tpu.memory_space<vmem>>, vector<1x768xf32>
    %18 = vector.broadcast %17 : vector<1x768xf32> to vector<8x768xf32>
    %19 = arith.mulf %16, %18 : vector<8x768xf32>
    %c0_7 = arith.constant 0 : index
    %c0_8 = arith.constant 0 : index
    %20 = vector.load %arg3[%c0_7, %c0_8] : memref<1x768xf32, #tpu.memory_space<vmem>>, vector<1x768xf32>
    %21 = vector.broadcast %20 : vector<1x768xf32> to vector<8x768xf32>
    %22 = arith.addf %19, %21 : vector<8x768xf32>
    %c0_9 = arith.constant 0 : index
    %c0_10 = arith.constant 0 : index
    %23 = vector.load %arg4[%c0_9, %c0_10] : memref<768x128xf32, #tpu.memory_space<vmem>>, vector<768x128xf32>
    %cst_11 = arith.constant dense<0.000000e+00> : vector<8x128xf32>
    %24 = tpu.matmul %22, %23, %cst_11 {dimension_numbers = #tpu.dot_dimension_numbers<[1], [0], [0], [1], [0, 0, 1, 1], [], []>} : vector<8x768xf32>, vector<768x128xf32>, vector<8x128xf32> -> vector<8x128xf32>
    %c0_12 = arith.constant 0 : index
    %c0_13 = arith.constant 0 : index
    %25 = vector.load %arg5[%c0_12, %c0_13] : memref<1x128xf32, #tpu.memory_space<vmem>>, vector<1x128xf32>
    %26 = vector.broadcast %25 : vector<1x128xf32> to vector<8x128xf32>
    %27 = arith.addf %24, %26 : vector<8x128xf32>
    %cst_14 = arith.constant 0.000000e+00 : f32
    %28 = vector.broadcast %cst_14 : f32 to vector<8x128xf32>
    %29 = arith.maximumf %27, %28 : vector<8x128xf32>
    %c0_15 = arith.constant 0 : index
    %c0_16 = arith.constant 0 : index
    %30 = vector.load %arg7[%c0_15, %c0_16] : memref<8x128xf32, #tpu.memory_space<vmem>>, vector<8x128xf32>
    tpu.vector_store %arg7[%c0_15, %c0_16], %29 {strides = array<i32>} : memref<8x128xf32, #tpu.memory_space<vmem>>, vector<8x128xf32>,
    return
  }
  func.func @transform_0(%arg0: i32) -> (i32, i32) {
    %c0_i32 = arith.constant 0 : i32
    %c0_i32_0 = arith.constant 0 : i32
    %c0_i32_1 = arith.constant 0 : i32
    return %c0_i32, %c0_i32_0 : i32, i32
  }
  func.func @transform_1(%arg0: i32) -> (i32, i32) {
    %c0_i32 = arith.constant 0 : i32
    %c0_i32_0 = arith.constant 0 : i32
    %c0_i32_1 = arith.constant 0 : i32
    return %c0_i32, %c0_i32_0 : i32, i32
  }
  func.func @transform_2(%arg0: i32) -> (i32, i32) {
    %c0_i32 = arith.constant 0 : i32
    %c0_i32_0 = arith.constant 0 : i32
    %c0_i32_1 = arith.constant 0 : i32
    return %c0_i32, %c0_i32_0 : i32, i32
  }
  func.func @transform_3(%arg0: i32) -> (i32, i32) {
    %c0_i32 = arith.constant 0 : i32
    %c0_i32_0 = arith.constant 0 : i32
    return %c0_i32, %arg0 : i32, i32
  }
  func.func @transform_4(%arg0: i32) -> (i32, i32) {
    %c0_i32 = arith.constant 0 : i32
    %c0_i32_0 = arith.constant 0 : i32
    return %c0_i32, %arg0 : i32, i32
  }
  func.func @transform_5(%arg0: i32) -> (i32, i32) {
    %c0_i32 = arith.constant 0 : i32
    %c0_i32_0 = arith.constant 0 : i32
    return %c0_i32, %arg0 : i32, i32
  }
  func.func @transform_6(%arg0: i32) -> (i32, i32) {
    %c0_i32 = arith.constant 0 : i32
    %c0_i32_0 = arith.constant 0 : i32
    return %c0_i32, %arg0 : i32, i32
  }
}

</mosaic_0001>

<bundles_post_ra>
// kernel: tpu_custom_call.1
= control target key start
LH: loop header
LB: loop body
LE: loop exit
PB: predicated region body
PF: predicated region fallthrough
CT: control target
= control target key end

     0   :  { %11 = vsyncpa [#allocation3], 0  ;;  %s1067_s0 = inlined_call_operand.hbm [shape: f32[8,6144], index: 0, kind: input, shape index: {}]   ;;  %s1068_s1 = inlined_call_operand.hbm [shape: f32[1,768], index: 1, kind: input, shape index: {}]   ;;  %s1069_s2 = inlined_call_operand.vmem [shape: f32[1,768], index: 2, kind: input, shape index: {}]   ;;  %s1070_s3 = inlined_call_operand.hbm [shape: f32[768,128], index: 3, kind: input, shape index: {}]   ;;  %s1071_s4 = inlined_call_operand.vmem [shape: f32[1,128], index: 4, kind: input, shape index: {}]   ;;  %s1072_s5 = inlined_call_operand.vmem [shape: u32[8,128], index: 5, kind: input, shape index: {}]   ;;  %s1073_s6 = inlined_call_operand.hbm [shape: f32[8,128], index: 6, kind: output, shape index: {}]  }
   0x1   :  { %12 = vsyncpa [#allocation6], 0 }
   0x2   :  { %13 = vsyncpa [#allocation4], 0  ;;  %s903_s21 = smov [#allocation5]   ;;  %s904_s23 = smov [#allocation2]  }
   0x3   :  { %s30_s22 = sshll.u32 %s903_s21, 4  ;;  %s20_s24 = sshll.u32 %s904_s23, 4  ;;  %s31_s22 = int_to_ptr.vmem [resolvable:$true] %s30_s22  ;;  %s944_s24 = int_to_ptr.vmem [resolvable:$true] %s20_s24 }
   0x4   :  { %s809_s27 = scalar_lea.hbm %s1068_s1, 96 }
   0x5   :  { %p810_p0 = scmp.ne.s32.totalorder %s1068_s1, %s809_s27  ;;  %p813_p1 = scmp.lt.u32.totalorder %s809_s27, %s1068_s1 }
   0x7   :  { %p815_p2 = pnand %p813_p1, %p810_p0 }
   0x9   :  { %818 = shalt.err (!%p815_p2)
}
   0xa   :  { %s819_s7 = scalar_lea.vmem %s31_s22, 96  ;;  %p824_p4 = scmp.lt.s32.totalorder %s31_s22, %s31_s22 }
   0xb   :  { %p820_p3 = scmp.ne.s32.totalorder %s31_s22, %s819_s7  ;;  %p825_p5 = scmp.lt.s32.totalorder %s819_s7, %s819_s7 }
   0xd   :  { %p826_p6 = por %p825_p5, %p824_p4 }
   0xf   :  { %p827_p7 = pnand %p826_p6, %p820_p3 }
  0x11   :  { %830 = shalt.err (!%p827_p7)
}
  0x12   :  { %33 = dma.hbm_to_vmem [thread:$0]  %s1068_s1, 96, %s31_s22, [#allocation6]  }
  0x13   :  { %s831_s12 = scalar_lea.hbm %s1067_s0, 768  ;;  %s833_s17 = scalar_lea.hbm %s1067_s0, 6144 }
  0x14   :  { %p832_p8 = scmp.ne.s32.totalorder %s1067_s0, %s831_s12  ;;  %p834_p9 = scmp.lt.u32.totalorder %s833_s17, %s831_s12 }
  0x15   :  { %p835_p10 = scmp.lt.u32.totalorder %s831_s12, %s1067_s0 }
  0x17   :  { %p836_p11 = por %p835_p10, %p834_p9 }
  0x19   :  { %p837_p12 = pnand %p836_p11, %p832_p8 }
  0x1b   :  { %840 = shalt.err (!%p837_p12)
}
  0x1c   :  { %s841_s1 = scalar_lea.vmem %s944_s24, 768  ;;  %p846_p0 = scmp.lt.s32.totalorder %s944_s24, %s944_s24 }
  0x1d   :  { %p842_p13 = scmp.ne.s32.totalorder %s944_s24, %s841_s1  ;;  %p847_p1 = scmp.lt.s32.totalorder %s841_s1, %s841_s1 }
  0x1f   :  { %p848_p2 = por %p847_p1, %p846_p0 }
  0x21   :  { %p849_p3 = pnand %p848_p2, %p842_p13 }
  0x23   :  { %852 = shalt.err (!%p849_p3)
}
  0x24   :  { %23 = dma.hbm_to_vmem [thread:$0]  %s1067_s0, 768, %s944_s24, [#allocation3]  }
  0x25   :  { %s905_s22 = smov [#allocation7]   ;;  %s853_s27 = scalar_lea.hbm %s1070_s3, 12288 }
  0x26   :  { %s41_s23 = sshll.u32 %s905_s22, 4  ;;  %p854_p4 = scmp.ne.s32.totalorder %s1070_s3, %s853_s27  ;;  %s42_s23 = int_to_ptr.vmem [resolvable:$true] %s41_s23 }
  0x27   :  { %p857_p5 = scmp.lt.u32.totalorder %s853_s27, %s1070_s3 }
  0x29   :  { %p859_p6 = pnand %p857_p5, %p854_p4 }
  0x2b   :  { %862 = shalt.err (!%p859_p6)
}
  0x2c   :  { %s863_s7 = scalar_lea.vmem %s42_s23, 12288  ;;  %p868_p8 = scmp.lt.s32.totalorder %s42_s23, %s42_s23 }
  0x2d   :  { %p864_p7 = scmp.ne.s32.totalorder %s42_s23, %s863_s7  ;;  %p869_p9 = scmp.lt.s32.totalorder %s863_s7, %s863_s7 }
  0x2f   :  { %p870_p10 = por %p869_p9, %p868_p8 }
  0x31   :  { %p871_p11 = pnand %p870_p10, %p864_p7 }
  0x33   :  { %874 = shalt.err (!%p871_p11)
}
  0x34   :  { %s906_s0 = smov 128   ;;  %s907_s24 = smov 8  }
  0x35   :  { %47 = dma.hbm_to_vmem [thread:$0]  %s1070_s3, 12288, %s42_s23, [#allocation6], %s906_s0, %s906_s0, %s907_s24  }
  0x36   :  { %897 = dma.done.wait [#allocation3], 768  }
  0x37   :  { %898 = vsyncadd [#allocation3], 4294966528 }
  0x38   :  { %899 = dma.done.wait [#allocation6], 12384  }
  0x39   :  { %900 = vsyncadd [#allocation6], 4294954912  ;;  %v274_v0 = vld [vmem:[#allocation7 + $0x80] sm:$0xff]  ;;  %v275_v1 = vld [vmem:[#allocation7 + $0x88] sm:$0xff]  ;;  %s908_s12 = smov [#allocation8]  }
  0x3a   :  { %v258_v2 = vld [vmem:[#allocation7] sm:$0xff]  ;;  %v695_v3 = vpack.c.bf16 %v275_v1, %v274_v0  ;;  %v259_v4 = vld [vmem:[#allocation7 + $0x8] sm:$0xff]  ;;  %v276_v9 = vld [vmem:[#allocation7 + $0x90] sm:$0xff]  ;;  %s579_s13 = sshll.u32 %s908_s12, 4  ;;  %s580_s13 = int_to_ptr.vmem [resolvable:$true] %s579_s13 }
  0x3b   :  { %v306_v5 = vld [vmem:[#allocation7 + $0x180] sm:$0xff]  ;;  %v307_v6 = vld [vmem:[#allocation7 + $0x188] sm:$0xff]  ;;  %v697_v7 = vpack.c.bf16 %v259_v4, %v258_v2  ;;  %v277_v10 = vld [vmem:[#allocation7 + $0x98] sm:$0xff]  ;;  %s875_s14 = scalar_lea.vmem %s580_s13, 128  ;;  %p880_p13 = scmp.lt.s32.totalorder %s580_s13, %s580_s13 }
  0x3c   :  { %v727_v8 = vpack.c.bf16 %v307_v6, %v306_v5  ;;  %v290_v11 = vld [vmem:[#allocation7 + $0x100] sm:$0xff]  ;;  %696 = vmatprep.subr.bf16.mxu0 %v695_v3  ;;  %v699_v12 = vpack.c.bf16 %v277_v10, %v276_v9  ;;  %v291_v13 = vld [vmem:[#allocation7 + $0x108] sm:$0xff]  ;;  %v260_v14 = vld [vmem:[#allocation7 + $0x10] sm:$0xff]  ;;  %p876_p12 = scmp.ne.s32.totalorder %s580_s13, %s875_s14  ;;  %p881_p0 = scmp.lt.s32.totalorder %s875_s14, %s875_s14 }
  0x3d   :  { %v261_v15 = vld [vmem:[#allocation7 + $0x18] sm:$0xff]  ;;  %698 = vmatpush3.bf16.msra.mxu0 %v697_v7  ;;  %v729_v16 = vpack.c.bf16 %v291_v13, %v290_v11  ;;  %v308_v18 = vld [vmem:[#allocation7 + $0x190] sm:$0xff]  ;;  %v278_v20 = vld [vmem:[#allocation7 + $0xa0] sm:$0xff] }
  0x3e   :  { %728 = vmatprep.subr.bf16.mxu1 %v727_v8  ;;  %v701_v17 = vpack.c.bf16 %v261_v15, %v260_v14  ;;  %v309_v19 = vld [vmem:[#allocation7 + $0x198] sm:$0xff]  ;;  %700 = vmatprep.subr.bf16.mxu0 %v699_v12  ;;  %v279_v22 = vld [vmem:[#allocation7 + $0xa8] sm:$0xff]  ;;  %v292_v23 = vld [vmem:[#allocation7 + $0x110] sm:$0xff]  ;;  %p882_p1 = por %p881_p0, %p880_p13 }
  0x3f   :  { %v731_v21 = vpack.c.bf16 %v309_v19, %v308_v18  ;;  %v293_v24 = vld [vmem:[#allocation7 + $0x118] sm:$0xff]  ;;  %730 = vmatpush3.bf16.msra.mxu1 %v729_v16  ;;  %v703_v25 = vpack.c.bf16 %v279_v22, %v278_v20  ;;  %v262_v27 = vld [vmem:[#allocation7 + $0x20] sm:$0xff]  ;;  %v263_v28 = vld [vmem:[#allocation7 + $0x28] sm:$0xff] }
  0x40   :  { %v733_v26 = vpack.c.bf16 %v293_v24, %v292_v23  ;;  %v310_v29 = vld [vmem:[#allocation7 + $0x1a0] sm:$0xff]  ;;  %v311_v30 = vld [vmem:[#allocation7 + $0x1a8] sm:$0xff]  ;;  %v280_v31 = vld [vmem:[#allocation7 + $0xb0] sm:$0xff]  ;;  %v705_v33 = vpack.c.bf16 %v263_v28, %v262_v27  ;;  %p883_p2 = pnand %p882_p1, %p876_p12 }
  0x41   :  { %732 = vmatprep.subr.bf16.mxu1 %v731_v21  ;;  %v281_v32 = vld [vmem:[#allocation7 + $0xb8] sm:$0xff]  ;;  %702 = vmatpush3.bf16.msra.mxu0 %v701_v17  ;;  %v735_v34 = vpack.c.bf16 %v311_v30, %v310_v29  ;;  %v294_v35 = vld [vmem:[#allocation7 + $0x120] sm:$0xff]  ;;  %v295_v36 = vld [vmem:[#allocation7 + $0x128] sm:$0xff] }
  0x42   :  { %v264_v37 = vld [vmem:[#allocation7 + $0x30] sm:$0xff]  ;;  %704 = vmatprep.subr.bf16.mxu0 %v703_v25  ;;  %v707_v38 = vpack.c.bf16 %v281_v32, %v280_v31  ;;  %v265_v39 = vld [vmem:[#allocation7 + $0x38] sm:$0xff]  ;;  %v737_v42 = vpack.c.bf16 %v295_v36, %v294_v35  ;;  %v282_v43 = vld [vmem:[#allocation7 + $0xc0] sm:$0xff] }
  0x43   :  { %v312_v40 = vld [vmem:[#allocation7 + $0x1b0] sm:$0xff]  ;;  %v313_v41 = vld [vmem:[#allocation7 + $0x1b8] sm:$0xff]  ;;  %734 = vmatpush3.bf16.msra.mxu1 %v733_v26  ;;  %v283_v44 = vld [vmem:[#allocation7 + $0xc8] sm:$0xff]  ;;  %v709_v48 = vpack.c.bf16 %v265_v39, %v264_v37 }
  0x44   :  { %736 = vmatprep.subr.bf16.mxu1 %v735_v34  ;;  %v739_v45 = vpack.c.bf16 %v313_v41, %v312_v40  ;;  %v296_v46 = vld [vmem:[#allocation7 + $0x130] sm:$0xff]  ;;  %v297_v47 = vld [vmem:[#allocation7 + $0x138] sm:$0xff]  ;;  %v314_v49 = vld [vmem:[#allocation7 + $0x1c0] sm:$0xff]  ;;  %v711_v51 = vpack.c.bf16 %v283_v44, %v282_v43 }
  0x45   :  { %706 = vmatpush3.bf16.msra.mxu0 %v705_v33  ;;  %v315_v50 = vld [vmem:[#allocation7 + $0x1c8] sm:$0xff]  ;;  %v266_v52 = vld [vmem:[#allocation7 + $0x40] sm:$0xff]  ;;  %v741_v54 = vpack.c.bf16 %v297_v47, %v296_v46  ;;  %v284_v55 = vld [vmem:[#allocation7 + $0xd0] sm:$0xff] }
  0x46   :  { %708 = vmatprep.subr.bf16.mxu0 %v707_v38  ;;  %v267_v53 = vld [vmem:[#allocation7 + $0x48] sm:$0xff]  ;;  %v285_v56 = vld [vmem:[#allocation7 + $0xd8] sm:$0xff]  ;;  %v743_v57 = vpack.c.bf16 %v315_v50, %v314_v49  ;;  %v298_v58 = vld [vmem:[#allocation7 + $0x140] sm:$0xff] }
  0x47   :  { %738 = vmatpush3.bf16.msra.mxu1 %v737_v42  ;;  %v299_v59 = vld [vmem:[#allocation7 + $0x148] sm:$0xff]  ;;  %v713_v60 = vpack.c.bf16 %v267_v53, %v266_v52  ;;  %v316_v61 = vld [vmem:[#allocation7 + $0x1d0] sm:$0xff]  ;;  %v317_v62 = vld [vmem:[#allocation7 + $0x1d8] sm:$0xff]  ;;  %v715_v63 = vpack.c.bf16 %v285_v56, %v284_v55 }
  0x48   :  { %740 = vmatprep.subr.bf16.mxu1 %v739_v45  ;;  %v268_v0 = vld [vmem:[#allocation7 + $0x50] sm:$0xff]  ;;  %v269_v1 = vld [vmem:[#allocation7 + $0x58] sm:$0xff]  ;;  %v745_v2 = vpack.c.bf16 %v299_v59, %v298_v58  ;;  %v286_v3 = vld [vmem:[#allocation7 + $0xe0] sm:$0xff]  ;;  %v747_v5 = vpack.c.bf16 %v317_v62, %v316_v61 }
  0x49   :  { %710 = vmatpush3.bf16.msra.mxu0 %v709_v48  ;;  %v287_v4 = vld [vmem:[#allocation7 + $0xe8] sm:$0xff]  ;;  %v300_v6 = vld [vmem:[#allocation7 + $0x150] sm:$0xff]  ;;  %v301_v7 = vld [vmem:[#allocation7 + $0x158] sm:$0xff]  ;;  %v717_v8 = vpack.c.bf16 %v269_v1, %v268_v0 }
  0x4a   :  { %712 = vmatprep.subr.bf16.mxu0 %v711_v51  ;;  %v318_v9 = vld [vmem:[#allocation7 + $0x1e0] sm:$0xff]  ;;  %v319_v10 = vld [vmem:[#allocation7 + $0x1e8] sm:$0xff]  ;;  %v990_v11 = vld [vmem:[#allocation2 + $0x8] sm:$0xff]  ;;  %v719_v12 = vpack.c.bf16 %v287_v4, %v286_v3  ;;  %v749_v16 = vpack.c.bf16 %v301_v7, %v300_v6 }
  0x4b   :  { %742 = vmatpush3.bf16.msra.mxu1 %v741_v54  ;;  %v270_v13 = vld [vmem:[#allocation7 + $0x60] sm:$0xff]  ;;  %v271_v14 = vld [vmem:[#allocation7 + $0x68] sm:$0xff]  ;;  %v73_v15 = vrot.slane %v990_v11, 4  ;;  %v288_v17 = vld [vmem:[#allocation7 + $0xf0] sm:$0xff]  ;;  %v751_v20 = vpack.c.bf16 %v319_v10, %v318_v9 }
  0x4c   :  { %744 = vmatprep.subr.bf16.mxu1 %v743_v57  ;;  %v289_v18 = vld [vmem:[#allocation7 + $0xf8] sm:$0xff]  ;;  %v302_v19 = vld [vmem:[#allocation7 + $0x160] sm:$0xff]  ;;  %v303_v21 = vld [vmem:[#allocation7 + $0x168] sm:$0xff]  ;;  %v721_v25 = vpack.c.bf16 %v271_v14, %v270_v13 }
  0x4d   :  { %714 = vmatpush3.bf16.msra.mxu0 %v713_v60  ;;  %v320_v22 = vld [vmem:[#allocation7 + $0x1f0] sm:$0xff]  ;;  %v74_v23 = vadd.f32 %v73_v15, %v990_v11  ;;  %v321_v26 = vld [vmem:[#allocation7 + $0x1f8] sm:$0xff]  ;;  %v64_v28 = vld [vmem:[#allocation2 + $0x18] sm:$0xff]  ;;  %v723_v30 = vpack.c.bf16 %v289_v18, %v288_v17  ;;  %v753_v36 = vpack.c.bf16 %v303_v21, %v302_v19 }
  0x4e   :  { %716 = vmatprep.subr.bf16.mxu0 %v715_v63  ;;  %v61_v24 = vld [vmem:[#allocation2] sm:$0xff]  ;;  %v63_v29 = vld [vmem:[#allocation2 + $0x10] sm:$0xff]  ;;  %v85_v34 = vrot.slane %v64_v28, 4  ;;  %v755_v40 = vpack.c.bf16 %v321_v26, %v320_v22  ;;  %v66_v62 = vld [vmem:[#allocation2 + $0x28] sm:$0xff] }
  0x4f   :  { %746 = vmatpush3.bf16.msra.mxu1 %v745_v2  ;;  %v67_v27 = vrot.slane %v61_v24, 4  ;;  %v272_v31 = vld [vmem:[#allocation7 + $0x70] sm:$0xff]  ;;  %v273_v32 = vld [vmem:[#allocation7 + $0x78] sm:$0xff]  ;;  %v75_v33 = vrot.slane %v74_v23, 2  ;;  %v79_v35 = vrot.slane %v63_v29, 4  ;;  %v338_v37 = vld [vmem:[#allocation7 + $0x280] sm:$0xff] }
  0x50   :  { %748 = vmatprep.subr.bf16.mxu1 %v747_v5  ;;  %v339_v38 = vld [vmem:[#allocation7 + $0x288] sm:$0xff]  ;;  %v304_v42 = vld [vmem:[#allocation7 + $0x170] sm:$0xff]  ;;  %v305_v43 = vld [vmem:[#allocation7 + $0x178] sm:$0xff]  ;;  %v86_v44 = vadd.f32 %v85_v34, %v64_v28  ;;  %v725_v46 = vpack.c.bf16 %v273_v32, %v272_v31  ;;  %v97_v3 = vrot.slane %v66_v62, 4 }
  0x51   :  { %718 = vmatpush3.bf16.msra.mxu0 %v717_v8  ;;  %v68_v39 = vadd.f32 %v67_v27, %v61_v24  ;;  %v76_v41 = vadd.f32 %v75_v33, %v74_v23  ;;  %v80_v45 = vadd.f32 %v79_v35, %v63_v29  ;;  %v759_v49 = vpack.c.bf16 %v339_v38, %v338_v37  ;;  %v65_v63 = vld [vmem:[#allocation2 + $0x20] sm:$0xff] }
  0x52   :  { %720 = vmatprep.subr.bf16.mxu0 %v719_v12  ;;  %v87_v50 = vrot.slane %v86_v44, 2  ;;  %v757_v52 = vpack.c.bf16 %v305_v43, %v304_v42  ;;  %v91_v5 = vrot.slane %v65_v63, 4  ;;  %v98_v9 = vadd.f32 %v97_v3, %v66_v62 }
  0x53   :  { %750 = vmatpush3.bf16.msra.mxu1 %v749_v16  ;;  %v69_v47 = vrot.slane %v68_v39, 2  ;;  %v77_v48 = vrot.slane %v76_v41, 1  ;;  %v81_v51 = vrot.slane %v80_v45, 2 }
  0x54   :  { %752 = vmatprep.subr.bf16.mxu1 %v751_v20  ;;  %v88_v55 = vadd.f32 %v87_v50, %v86_v44  ;;  %v92_v12 = vadd.f32 %v91_v5, %v65_v63 }
  0x55   :  { %722 = vmatpush3.bf16.msra.mxu0 %v721_v25  ;;  %v70_v53 = vadd.f32 %v69_v47, %v68_v39  ;;  %v78_v54 = vadd.f32 %v77_v48, %v76_v41  ;;  %v82_v56 = vadd.f32 %v81_v51, %v80_v45 }
  0x56   :  { %724 = vmatprep.subr.bf16.mxu0 %v723_v30  ;;  %v89_v59 = vrot.slane %v88_v55, 1  ;;  %v93_v17 = vrot.slane %v92_v12, 2 }
  0x57   :  { %754 = vmatpush3.bf16.msra.mxu1 %v753_v36  ;;  %v71_v57 = vrot.slane %v70_v53, 1  ;;  %v105_v58 = vmul.f32 0.125, %v78_v54  ;;  %v83_v60 = vrot.slane %v82_v56, 1 }
  0x58   :  { %756 = vmatprep.subr.bf16.mxu1 %v755_v40  ;;  %v90_v1 = vadd.f32 %v89_v59, %v88_v55  ;;  %v94_v23 = vadd.f32 %v93_v17, %v92_v12  ;;  %v1022_v12 = vld [vmem:[#allocation5] sm:$0x3f] }
  0x59   :  { %726 = vmatpush3.bf16.msra.mxu0 %v725_v46  ;;  %v72_v61 = vadd.f32 %v71_v57, %v70_v53  ;;  %v995_v0 = vsub.f32 %v990_v11, %v105_v58  ;;  %v84_v2 = vadd.f32 %v83_v60, %v82_v56  ;;  %v99_v11 = vrot.slane %v98_v9, 2 }
  0x5a   :  { %760 = vmatprep.subr.bf16.mxu0 %v759_v49  ;;  %v107_v7 = vmul.f32 0.125, %v90_v1 }
  0x5b   :  { %758 = vmatpush3.bf16.msra.mxu1 %v757_v52  ;;  %v104_v4 = vmul.f32 0.125, %v72_v61  ;;  %v117_v6 = vmul.f32 %v995_v0, %v995_v0  ;;  %v106_v8 = vmul.f32 0.125, %v84_v2  ;;  %v100_v21 = vadd.f32 %v99_v11, %v98_v9 }
  0x5c   :  { %v1001_v14 = vsub.f32 %v64_v28, %v107_v7  ;;  %v184_v52 = vlaneseq }
  0x5d   :  { %v999_v10 = vsub.f32 %v61_v24, %v104_v4  ;;  %v128_v13 = vrot.slane %v117_v6, 4  ;;  %v1003_v15 = vsub.f32 %v63_v29, %v106_v8  ;;  %v101_v27 = vrot.slane %v100_v21, 1 }
  0x5e   :  { %v119_v19 = vmul.f32 %v1001_v14, %v1001_v14  ;;  %v95_v29 = vrot.slane %v94_v23, 1  ;;  %v1019_v1 = vshrl.u32 %v184_v52, 7 }
  0x5f   :  { %v116_v16 = vmul.f32 %v999_v10, %v999_v10  ;;  %v129_v18 = vadd.f32 %v128_v13, %v117_v6  ;;  %v118_v20 = vmul.f32 %v1003_v15, %v1003_v15  ;;  %v102_v33 = vadd.f32 %v101_v27, %v100_v21 }
  0x60   :  { %v140_v25 = vrot.slane %v119_v19, 4  ;;  %v96_v35 = vadd.f32 %v95_v29, %v94_v23  ;;  %v190_v9 = vsub.s32 1, %v1019_v1  ;;  %v186_v17 = vsub.s32 0, %v1019_v1 }
  0x61   :  { %v122_v22 = vrot.slane %v116_v16, 4  ;;  %v130_v24 = vrot.slane %v129_v18, 2  ;;  %v134_v26 = vrot.slane %v118_v20, 4  ;;  %v109_v39 = vmul.f32 0.125, %v102_v33 }
  0x62   :  { %v141_v31 = vadd.f32 %v140_v25, %v119_v19  ;;  %v108_v41 = vmul.f32 0.125, %v96_v35  ;;  %v191_v19 = vrot.slane %v1022_v12, %v190_v9  ;;  %v187_v27 = vrot.slane %v1022_v12, %v186_v17  ;;  %v322_v35 = vld [vmem:[#allocation7 + $0x200] sm:$0xff] }
  0x63   :  { %v123_v28 = vadd.f32 %v122_v22, %v116_v16  ;;  %v131_v30 = vadd.f32 %v130_v24, %v129_v18  ;;  %v135_v32 = vadd.f32 %v134_v26, %v118_v20  ;;  %v1011_v45 = vsub.f32 %v66_v62, %v109_v39  ;;  %v1027_v16 = vld [vmem:[%s1069_s2] sm:$0x3f] }
  0x64   :  { %v142_v37 = vrot.slane %v141_v31, 2  ;;  %v1013_v47 = vsub.f32 %v65_v63, %v108_v41  ;;  %v198_v20 = vsub.s32 3, %v1019_v1  ;;  %v194_v22 = vsub.s32 2, %v1019_v1  ;;  %v340_v41 = vld [vmem:[#allocation7 + $0x290] sm:$0xff] }
  0x65   :  { %v124_v34 = vrot.slane %v123_v28, 2  ;;  %v132_v36 = vrot.slane %v131_v30, 1  ;;  %v136_v38 = vrot.slane %v135_v32, 2  ;;  %v121_v51 = vmul.f32 %v1011_v45, %v1011_v45 }
  0x66   :  { %v143_v43 = vadd.f32 %v142_v37, %v141_v31  ;;  %v120_v54 = vmul.f32 %v1013_v47, %v1013_v47  ;;  %v229_v25 = vrot.slane %v1027_v16, %v190_v9  ;;  %v199_v31 = vrot.slane %v1022_v12, %v198_v20 }
  0x67   :  { %v125_v40 = vadd.f32 %v124_v34, %v123_v28  ;;  %v133_v42 = vadd.f32 %v132_v36, %v131_v30  ;;  %v137_v44 = vadd.f32 %v136_v38, %v135_v32  ;;  %v152_v58 = vrot.slane %v121_v51, 4  ;;  %v323_v36 = vld [vmem:[#allocation7 + $0x208] sm:$0xff] }
  0x68   :  { %v144_v49 = vrot.slane %v143_v43, 1  ;;  %v146_v60 = vrot.slane %v120_v54, 4  ;;  %v225_v34 = vrot.slane %v1027_v16, %v186_v17  ;;  %v195_v37 = vrot.slane %v1022_v12, %v194_v22  ;;  %v346_v17 = vld [vmem:[#allocation7 + $0x2c0] sm:$0xff] }
  0x69   :  { %v126_v46 = vrot.slane %v125_v40, 1  ;;  %v159_v48 = vmul.f32 0.125, %v133_v42  ;;  %v138_v50 = vrot.slane %v137_v44, 1  ;;  %v153_v63 = vadd.f32 %v152_v58, %v121_v51  ;;  %v341_v42 = vld [vmem:[#allocation7 + $0x298] sm:$0xff] }
  0x6a   :  { %v145_v56 = vadd.f32 %v144_v49, %v143_v43  ;;  %v147_v3 = vadd.f32 %v146_v60, %v120_v54  ;;  %v763_v52 = vpack.c.bf16 %v341_v42, %v340_v41  ;;  %v325_v54 = vld [vmem:[#allocation7 + $0x218] sm:$0xff] }
  0x6b   :  { %v127_v53 = vadd.f32 %v126_v46, %v125_v40  ;;  %v165_v55 = vadd.f32 1e-05, %v159_v48  ;;  %v139_v57 = vadd.f32 %v138_v50, %v137_v44  ;;  %v154_v6 = vrot.slane %v153_v63, 2 }
  0x6c   :  { %v161_v61 = vmul.f32 0.125, %v145_v56  ;;  %v148_v7 = vrot.slane %v147_v3, 2  ;;  %v237_v40 = vrot.slane %v1027_v16, %v198_v20  ;;  %v761_v48 = vpack.c.bf16 %v323_v36, %v322_v35  ;;  %v343_v56 = vld [vmem:[#allocation7 + $0x2a8] sm:$0xff]  ;;  %v334_v36 = vld [vmem:[#allocation7 + $0x260] sm:$0xff] }
  0x6d   :  { %v158_v59 = vmul.f32 0.125, %v127_v53  ;;  %797 = vrsqrt.f32 %v165_v55  ;;  %v160_v62 = vmul.f32 0.125, %v139_v57  ;;  %v155_v8 = vadd.f32 %v154_v6, %v153_v63  ;;  %v324_v53 = vld [vmem:[#allocation7 + $0x210] sm:$0xff] }
  0x6e   :  { %v167_v4 = vadd.f32 1e-05, %v161_v61  ;;  %v149_v11 = vadd.f32 %v148_v7, %v147_v3  ;;  %v206_v57 = vsub.s32 5, %v1019_v1  ;;  %v326_v61 = vld [vmem:[#allocation7 + $0x220] sm:$0xff]  ;;  %v344_v63 = vld [vmem:[#allocation7 + $0x2b0] sm:$0xff] }
  0x6f   :  { %v164_v2 = vadd.f32 1e-05, %v158_v59  ;;  %v166_v5 = vadd.f32 1e-05, %v160_v62  ;;  %v156_v13 = vrot.slane %v155_v8, 1  ;;  %v327_v62 = vld [vmem:[#allocation7 + $0x228] sm:$0xff] }
  0x70   :  { %v150_v26 = vrot.slane %v149_v11, 1  ;;  %v207_v3 = vrot.slane %v1022_v12, %v206_v57  ;;  %v769_v6 = vpack.c.bf16 %v327_v62, %v326_v61 }
  0x71   :  { %799 = vrsqrt.f32 %v164_v2  ;;  %v157_v18 = vadd.f32 %v156_v13, %v155_v8  ;;  %v345_v2 = vld [vmem:[#allocation7 + $0x2b8] sm:$0xff]  ;;  %v245_v8 = vrot.slane %v1027_v16, %v206_v57  ;;  %v328_v13 = vld [vmem:[#allocation7 + $0x230] sm:$0xff] }
  0x72   :  { %801 = vrsqrt.f32 %v167_v4  ;;  %v151_v43 = vadd.f32 %v150_v26, %v149_v11  ;;  %v771_v9 = vpack.c.bf16 %v345_v2, %v344_v63  ;;  %v329_v11 = vld [vmem:[#allocation7 + $0x238] sm:$0xff] }
  0x73   :  { %803 = vrsqrt.f32 %v166_v5  ;;  %v163_v23 = vmul.f32 0.125, %v157_v18  ;;  %v347_v18 = vld [vmem:[#allocation7 + $0x2c8] sm:$0xff]  ;;  %v773_v20 = vpack.c.bf16 %v329_v11, %v328_v13  ;;  %v349_v26 = vld [vmem:[#allocation7 + $0x2d8] sm:$0xff] }
  0x74   :  { %v162_v58 = vmul.f32 0.125, %v151_v43  ;;  %v336_v43 = vld [vmem:[#allocation7 + $0x270] sm:$0xff] }
  0x75   :  { %v169_v28 = vadd.f32 1e-05, %v163_v23  ;;  %v330_v23 = vld [vmem:[#allocation7 + $0x240] sm:$0xff] }
  0x76   :  { %v168_v4 = vadd.f32 1e-05, %v162_v58 }
  0x77   :  { %v798_v21 = vpop.eup %797  ;;  %805 = vrsqrt.f32 %v169_v28  ;;  %v332_v28 = vld [vmem:[#allocation7 + $0x250] sm:$0xff] }
  0x78   :  { %v177_v24 = vmul.f32 %v798_v21, %v995_v0  ;;  %807 = vrsqrt.f32 %v168_v4 }
  0x7a   :  { %v215_v30 = vmul.f32 %v191_v19, %v177_v24  ;;  %v331_v24 = vld [vmem:[#allocation7 + $0x248] sm:$0xff] }
  0x7b   :  { %v800_v29 = vpop.eup %799 }
  0x7c   :  { %v802_v32 = vpop.eup %801  ;;  %v176_v33 = vmul.f32 %v800_v29, %v999_v10  ;;  %v253_v38 = vadd.f32 %v229_v25, %v215_v30  ;;  %v233_v10 = vrot.slane %v1027_v16, %v194_v22  ;;  %v775_v22 = vpack.c.bf16 %v347_v18, %v346_v17  ;;  %v348_v25 = vld [vmem:[#allocation7 + $0x2d0] sm:$0xff]  ;;  %v333_v29 = vld [vmem:[#allocation7 + $0x258] sm:$0xff]  ;;  %v350_v30 = vld [vmem:[#allocation7 + $0x2e0] sm:$0xff] }
  0x7d   :  { %v804_v0 = vpop.eup %803  ;;  %v179_v39 = vmul.f32 %v802_v32, %v1001_v14  ;;  %v342_v14 = vld [vmem:[#allocation7 + $0x2a0] sm:$0xff]  ;;  %v202_v32 = vsub.s32 4, %v1019_v1 }
  0x7e   :  { %v214_v44 = vmul.f32 %v187_v27, %v176_v33  ;;  %v178_v46 = vmul.f32 %v804_v0, %v1003_v15  ;;  %425 = vmatprep.mubr.f32.mxu0 %v253_v38  ;;  %v765_v15 = vpack.c.bf16 %v325_v54, %v324_v53  ;;  %v767_v60 = vpack.c.bf16 %v343_v56, %v342_v14  ;;  %v352_v0 = vld [vmem:[#allocation7 + $0x2f0] sm:$0xff]  ;;  %v353_v38 = vld [vmem:[#allocation7 + $0x2f8] sm:$0xff] }
  0x7f   :  { %v217_v49 = vmul.f32 %v199_v31, %v179_v39  ;;  %v779_v27 = vpack.c.bf16 %v349_v26, %v348_v25  ;;  %v351_v31 = vld [vmem:[#allocation7 + $0x2e8] sm:$0xff]  ;;  %v787_v42 = vpack.c.bf16 %v353_v38, %v352_v0 }
  0x80   :  { %v252_v50 = vadd.f32 %v225_v34, %v214_v44  ;;  %v216_v51 = vmul.f32 %v195_v37, %v178_v46  ;;  %v781_v34 = vpack.c.bf16 %v333_v29, %v332_v28  ;;  %v783_v35 = vpack.c.bf16 %v351_v31, %v350_v30  ;;  %v335_v37 = vld [vmem:[#allocation7 + $0x268] sm:$0xff]  ;;  %v337_v44 = vld [vmem:[#allocation7 + $0x278] sm:$0xff] }
  0x81   :  { %v255_v55 = vadd.f32 %v237_v40, %v217_v49  ;;  %v806_v5 = vpop.eup %805  ;;  %v203_v40 = vrot.slane %v1022_v12, %v202_v32  ;;  %v785_v41 = vpack.c.bf16 %v335_v37, %v334_v36  ;;  %v241_v46 = vrot.slane %v1027_v16, %v202_v32 }
  0x82   :  { %426 = vmatmul.mubr.f32.vlgmr.msra.gmra.mrb[0].mxu0 %v252_v50  ;;  %v254_v59 = vadd.f32 %v233_v10, %v216_v51  ;;  %v181_v7 = vmul.f32 %v806_v5, %v1011_v45  ;;  %v777_v45 = vpack.c.bf16 %v331_v24, %v330_v23  ;;  %v808_v33 = vpop.eup %807  ;;  %v789_v10 = vpack.c.bf16 %v337_v44, %v336_v43 }
  0x83   :  { %762 = vmatpush3.bf16.msra.mxu0 %v761_v48  ;;  %495 = vmatprep.mubr.f32.mxu1 %v255_v55  ;;  %v180_v39 = vmul.f32 %v808_v33, %v1013_v47  ;;  %v589_v47 = vld [vmem:[%s1071_s4] ss:$0 sm:$0xff] }
  0x84   :  { %496 = vmatmul.mubr.f32.vlgmr.msra.gmra.mrb[0].mxu1 %v254_v59  ;;  %764 = vmatprep.subr.bf16.mxu0 %v763_v52  ;;  %v219_v19 = vmul.f32 %v207_v3, %v181_v7 }
  0x85   :  { %v218_v1 = vmul.f32 %v203_v40, %v180_v39 }
  0x86   :  { %v257_v21 = vadd.f32 %v245_v8, %v219_v19 }
  0x87   :  { %766 = vmatpush3.bf16.msra.mxu0 %v765_v15  ;;  %v256_v48 = vadd.f32 %v241_v46, %v218_v1 }
  0x88   :  { %768 = vmatprep.subr.bf16.mxu0 %v767_v60  ;;  %565 = vmatprep.mubr.f32.mxu0 %v257_v21 }
  0x8b   :  { %770 = vmatpush3.bf16.msra.mxu0 %v769_v6 }
  0x8c   :  { %772 = vmatprep.subr.bf16.mxu0 %v771_v9 }
  0x8f   :  { %774 = vmatpush3.bf16.msra.mxu0 %v773_v20 }
  0x90   :  { %776 = vmatprep.subr.bf16.mxu0 %v775_v22 }
  0x93   :  { %778 = vmatpush3.bf16.msra.mxu0 %v777_v45 }
  0x94   :  { %780 = vmatprep.subr.bf16.mxu0 %v779_v27 }
  0x97   :  { %782 = vmatpush3.bf16.msra.mxu0 %v781_v34 }
  0x98   :  { %784 = vmatprep.subr.bf16.mxu0 %v783_v35 }
  0x9b   :  { %786 = vmatpush3.bf16.msra.mxu0 %v785_v41 }
  0x9c   :  { %788 = vmatprep.subr.bf16.mxu0 %v787_v42 }
  0x9f   :  { %790 = vmatpush3.bf16.msra.mxu0 %v789_v10 }
  0xa2   :  { %566 = vmatmul.mubr.f32.vlgmr.msra.gmra.mrb[2].mxu0 %v256_v48 }
 0x155   :  { %v622_v49 = vpop.f32.mrb[0].mxu0 }
 0x156   :  { %v623_v12 = vpop.f32.mrb[1].mxu0 }
 0x157   :  { %v624_v50 = vadd.f32 %v623_v12, %v622_v49  ;;  %v657_v51 = vpop.f32.mrb[0].mxu1 }
 0x158   :  { %v658_v52 = vpop.f32.mrb[1].mxu1 }
 0x159   :  { %v428_v53 = vadd.f32 %v624_v50, %v589_v47  ;;  %v659_v54 = vadd.f32 %v658_v52, %v657_v51 }
 0x15b   :  { %v498_v55 = vadd.f32 %v659_v54, %v428_v53 }
 0x175   :  { %v692_v14 = vpop.f32.mrb[2].mxu0 }
 0x176   :  { %v693_v16 = vpop.f32.mrb[3].mxu0 }
 0x177   :  { %v694_v56 = vadd.f32 %v693_v16, %v692_v14 }
 0x179   :  { %v568_v57 = vadd.f32 %v694_v56, %v498_v55 }
 0x17b   :  { %v571_v58 = vmax.f32 %v568_v57, 0.0 }
 0x17d   :  { %572 = vst [vmem:[#allocation8] sm:$0xff] %v571_v58 }
 0x17e   :  { %886 = shalt.err (!%p883_p2)
}
 0x17f   :  { %s887_s16 = scalar_lea.hbm %s1073_s6, 128 }
 0x180   :  { %p888_p3 = scmp.ne.s32.totalorder %s1073_s6, %s887_s16  ;;  %p891_p4 = scmp.lt.u32.totalorder %s887_s16, %s1073_s6 }
 0x182   :  { %p893_p5 = pnand %p891_p4, %p888_p3 }
 0x184   :  { %896 = shalt.err (!%p893_p5)
}
 0x185   :  { %582 = dma.vmem_to_hbm [thread:$0]  %s580_s13, 128, %s1073_s6, [#allocation4]  }
 0x186   :  { %901 = dma.done.wait [#allocation4], 128  }
 0x187   :  { %902 = vsyncadd [#allocation4], 4294967168 }
 0x188   :  { %586 = vsyncpa [#allocation3], 1 }
 0x189   :  { %587 = vsyncpa [#allocation6], 1 }
 0x18a   :  { %588 = vsyncpa [#allocation4], 1 }

</bundles_post_ra>
